<compile_context>
chip_gen: v6e
topology: v6e:2x2x1
jax: 0.10.0
libtpu: 0.0.40
codegen_flags: <defaults>
</compile_context>

<pallas_src>
import jax
import jax.numpy as jnp
from jax import lax
from jax.experimental import pallas as pl
from jax.experimental.pallas import tpu as pltpu

CHUNK = 5120            # hard-coded slice length in the PyTorch forward (== dim)
NUM_SVM = 4
DIM = CHUNK
HALF = DIM // 2         # 2560 = lane extent of the 8-sublane-packed big operands
PACKED_W = HALF + 128   # fused constant blob width (svm_w halves | bias/vote slab)
BT = 8                  # batch tile for the batched entry point


def mos_kernel(x_ref, wp_ref, out_ref):
    """x_ref : (bt, 2n, HALF)  batch block of X, 8-sublane packed per example
       wp_ref: (8, HALF+128)   fused constants: [:, :HALF]   = stacked SVM weights,
                               [:, HALF:]      = param slab (row 0 = bias on lanes<n,
                                                 rows 1..n = vote matrix V, zero pad)
       out_ref: (bt, 128)      lanes 0..n-1 = tmp, lane n = predict, rest zeros."""
    n = NUM_SVM
    f32 = jnp.float32
    bt = x_ref.shape[0]

    w = wp_ref[:, 0:HALF]             # (2n, HALF)
    p = wp_ref[:, HALF:HALF + 128]    # (8, 128)

    # Per-half dot products with full sublane occupancy: ps[b, k] = <x[b,k,:], w[k,:]>
    ps = jnp.sum(x_ref[...] * w[None, :, :], axis=-1)                 # (bt, 2n)

    lane2n = lax.broadcasted_iota(jnp.int32, (bt, 2 * n), 1)
    lane = lax.broadcasted_iota(jnp.int32, (bt, 128), 1)

    # tmp[b, i] = ps[b, 2i] + ps[b, 2i+1] + bias[i], laid out on lanes 0..n-1.
    # Bias lanes >= n are zero in the slab, so a plain broadcast-add is exact.
    tmp128 = jnp.broadcast_to(p[0:1, :], (bt, 128))                   # (bt, 128)
    for i in range(n):                                                # n static & tiny
        pair = (lane2n == 2 * i) | (lane2n == 2 * i + 1)
        ti = jnp.sum(jnp.where(pair, ps, 0.0), axis=-1, keepdims=True)   # (bt, 1)
        tmp128 = tmp128 + jnp.where(lane == i, ti, 0.0)

    # vote Linear (no bias) + sigmoid; lanes >= n are zero on both operands.
    vw128 = jnp.zeros((bt, 128), f32)
    for i in range(n):
        vi = p[1 + i:2 + i, :]                                        # (1, 128) = V[i, :]
        logit_i = jnp.sum(vi * tmp128, axis=-1, keepdims=True)        # (bt, 1)
        vw128 = vw128 + jnp.where(lane == i, jax.nn.sigmoid(logit_i), 0.0)

    # predict[b] = sum_i vote_weight[b, i] * tmp[b, i]
    pred = jnp.sum(vw128 * tmp128, axis=-1, keepdims=True)            # (bt, 1)

    # Single lane-dense store: tmp on lanes 0..n-1, predict on lane n.
    out_ref[...] = tmp128 + jnp.where(lane == n, pred, 0.0)


def _cost(batch):
    flops = batch * (2 * NUM_SVM * DIM + 4 * NUM_SVM * NUM_SVM + 2 * NUM_SVM)
    bytes_accessed = batch * (2 * NUM_SVM * HALF * 4 + 128 * 4) + 8 * PACKED_W * 4
    return pl.CostEstimate(flops=flops, transcendentals=batch * NUM_SVM,
                           bytes_accessed=bytes_accessed)


@jax.jit
def _forward_single(X, wp):
    """X: (NUM_SVM*DIM,). Returns (predict (1,), tmp (NUM_SVM,)) == torch forward."""
    x = X.astype(jnp.float32).reshape(1, 2 * NUM_SVM, HALF)           # free reshape
    out = pl.pallas_call(
        mos_kernel,
        out_shape=jax.ShapeDtypeStruct((1, 128), jnp.float32),
        in_specs=[pl.BlockSpec(memory_space=pltpu.MemorySpace.VMEM),
                  pl.BlockSpec(memory_space=pltpu.MemorySpace.VMEM)],
        out_specs=pl.BlockSpec(memory_space=pltpu.MemorySpace.VMEM),
        cost_estimate=_cost(1),
    )(x, wp)
    predict = out[0, NUM_SVM:NUM_SVM + 1]   # (1,)
    tmp = out[0, :NUM_SVM]                  # (NUM_SVM,) == torch.cat(tmp_list)
    return predict, tmp


@jax.jit
def _forward_batched(Xb, wp):
    """Xb: (B, NUM_SVM*DIM). Returns (predict (B,), tmp (B, NUM_SVM))."""
    B = Xb.shape[0]
    Bp = pl.cdiv(B, BT) * BT
    x = Xb.astype(jnp.float32).reshape(B, 2 * NUM_SVM, HALF)
    if Bp != B:
        x = jnp.pad(x, ((0, Bp - B), (0, 0), (0, 0)))
    out = pl.pallas_call(
        mos_kernel,
        out_shape=jax.ShapeDtypeStruct((Bp, 128), jnp.float32),
        grid=(Bp // BT,),
        in_specs=[pl.BlockSpec((BT, 2 * NUM_SVM, HALF), lambda b: (b, 0, 0)),
                  pl.BlockSpec((8, PACKED_W), lambda b: (0, 0))],   # VMEM-resident consts
        out_specs=pl.BlockSpec((BT, 128), lambda b: (b, 0)),
        compiler_params=pltpu.CompilerParams(dimension_semantics=("parallel",)),
        cost_estimate=_cost(Bp),
    )(x, wp)
    return out[:B, NUM_SVM], out[:B, :NUM_SVM]


class MoSAlterFx:
    """JAX/Pallas port of MoS_alter_fx. Constants are packed once at init."""

    def __init__(self, svm_w, svm_b, vote_w, gate_w=None):
        n, dim = svm_w.shape
        assert n == NUM_SVM and dim == DIM, "kernel hard-codes num_svm=4, dim=5120"
        assert 2 * n == 8, "sublane packing assumes 2*num_svm == 8"
        assert 1 + n <= 8 and n < 128, "param slab needs num_svm+1 <= 8 rows, < 128 lanes"
        assert HALF % 128 == 0, "dim/2 must be a multiple of 128 for the free repack"
        # TODO(synk): self.gate = Linear(num_svm*dim, num_svm, bias=False) exists in the
        # PyTorch __init__ but is never used in forward(); no compute is emitted for it.
        w8 = svm_w.astype(jnp.float32).reshape(2 * n, HALF)           # (8, 2560)
        slab = jnp.zeros((8, 128), jnp.float32)
        slab = slab.at[0, :n].set(svm_b.astype(jnp.float32))
        slab = slab.at[1:1 + n, :n].set(vote_w.astype(jnp.float32))
        # One fused constant blob -> a single constant input DMA per forward call.
        self.wp = jax.device_put(jnp.concatenate([w8, slab], axis=1))  # (8, 2688)

    def __call__(self, X):
        return _forward_single(X, self.wp)

    def forward_batched(self, Xb):
        return _forward_batched(Xb, self.wp)


# ------------------------- plain-JAX reference (torch mirror) -------------------------
def reference(X, svm_w, svm_b, vote_w):
    tmps = []
    for i in range(NUM_SVM):
        xs = X[i * CHUNK:(i + 1) * CHUNK]
        tmps.append(jnp.sum(svm_w[i] * xs) + svm_b[i])
    t = jnp.stack(tmps)                                                # == torch.cat(tmp_list)
    vote_weight = jax.nn.sigmoid(jnp.sum(vote_w * t[None, :], axis=-1))
    pred = jnp.sum(vote_weight * t).reshape(1)
    return pred, t


if __name__ == "__main__":
    key = jax.random.PRNGKey(0)
    k1, k2, k3, k4, k5 = jax.random.split(key, 5)

    # Deterministic synthetic parameters (shapes implied by the module __init__/forward).
    X = jax.random.normal(k1, (NUM_SVM * CHUNK,), dtype=jnp.float32)
    svm_w = jax.random.normal(k2, (NUM_SVM, DIM), dtype=jnp.float32) * 0.02
    svm_b = jax.random.normal(k3, (NUM_SVM,), dtype=jnp.float32) * 0.02
    vote_w = jax.random.normal(k4, (NUM_SVM, NUM_SVM), dtype=jnp.float32) * 0.1

    model = MoSAlterFx(svm_w, svm_b, vote_w)

    # Single-X forward (matches the PyTorch module semantics).
    predict, tmp = model(X)
    jax.block_until_ready((predict, tmp))
    ref_pred, ref_tmp = reference(X, svm_w, svm_b, vote_w)
    assert predict.shape == (1,) and tmp.shape == (NUM_SVM,)
    assert jnp.allclose(predict, ref_pred, atol=1e-3, rtol=1e-3)
    assert jnp.allclose(tmp, ref_tmp, atol=1e-3, rtol=1e-3)

    # Batched forward (the >2x lever from the perf review): B=16 independent X vectors.
    B = 16
    Xb = jax.random.normal(k5, (B, NUM_SVM * CHUNK), dtype=jnp.float32)
    pred_b, tmp_b = model.forward_batched(Xb)
    jax.block_until_ready((pred_b, tmp_b))
    ref_pb, ref_tb = jax.vmap(lambda x: reference(x, svm_w, svm_b, vote_w))(Xb)
    assert pred_b.shape == (B,) and tmp_b.shape == (B, NUM_SVM)
    assert jnp.allclose(pred_b, ref_pb[:, 0], atol=1e-3, rtol=1e-3)
    assert jnp.allclose(tmp_b, ref_tb, atol=1e-3, rtol=1e-3)

    print("KERNEL_OK")
</pallas_src>

<mosaic_0001>
module attributes {stable_mosaic.version = 11 : i64} {
  func.func @mos_kernel(%arg0: memref<1x8x2560xf32, #tpu.memory_space<vmem>>, %arg1: memref<8x2688xf32, #tpu.memory_space<vmem>>, %arg2: memref<1x128xf32, #tpu.memory_space<vmem>>) attributes {dimension_semantics = [], scalar_prefetch = 0 : i64, scratch_operands = 0 : i64, tpu.core_type = #tpu.core_type<tc>} {
    %c0 = arith.constant 0 : index
    %c0_0 = arith.constant 0 : index
    %0 = vector.load %arg1[%c0, %c0_0] : memref<8x2688xf32, #tpu.memory_space<vmem>>, vector<8x2560xf32>
    %c0_1 = arith.constant 0 : index
    %c2560 = arith.constant 2560 : index
    %1 = vector.load %arg1[%c0_1, %c2560] : memref<8x2688xf32, #tpu.memory_space<vmem>>, vector<8x128xf32>
    %c0_2 = arith.constant 0 : index
    %c0_3 = arith.constant 0 : index
    %c0_4 = arith.constant 0 : index
    %2 = vector.load %arg0[%c0_2, %c0_3, %c0_4] : memref<1x8x2560xf32, #tpu.memory_space<vmem>>, vector<1x8x2560xf32>
    %3 = vector.shape_cast %0 : vector<8x2560xf32> to vector<1x8x2560xf32>
    %4 = arith.mulf %2, %3 : vector<1x8x2560xf32>
    %cst = arith.constant dense<0.000000e+00> : vector<1x8xf32>
    %5 = vector.multi_reduction <add>, %4, %cst [2] : vector<1x8x2560xf32> to vector<1x8xf32>
    %6 = tpu.iota {dimensions = array<i32: 1>} : vector<1x8xi32>
    %7 = tpu.iota {dimensions = array<i32: 1>} : vector<1x128xi32>
    %8 = vector.extract_strided_slice %1 {offsets = [0, 0], sizes = [1, 128], strides = [1, 1]} : vector<8x128xf32> to vector<1x128xf32>
    %c0_i32 = arith.constant 0 : i32
    %9 = vector.broadcast %c0_i32 : i32 to vector<1x8xi32>
    %10 = arith.cmpi eq, %6, %9 : vector<1x8xi32>
    %c1_i32 = arith.constant 1 : i32
    %11 = vector.broadcast %c1_i32 : i32 to vector<1x8xi32>
    %12 = arith.cmpi eq, %6, %11 : vector<1x8xi32>
    %13 = arith.ori %10, %12 : vector<1x8xi1>
    %cst_5 = arith.constant 0.000000e+00 : f32
    %14 = vector.broadcast %cst_5 : f32 to vector<1x8xf32>
    %15 = arith.select %13, %5, %14 : vector<1x8xi1>, vector<1x8xf32>
    %cst_6 = arith.constant dense<0.000000e+00> : vector<1xf32>
    %16 = vector.multi_reduction <add>, %15, %cst_6 [1] : vector<1x8xf32> to vector<1xf32>
    %17 = vector.shape_cast %16 : vector<1xf32> to vector<1x1xf32>
    %c0_i32_7 = arith.constant 0 : i32
    %18 = vector.broadcast %c0_i32_7 : i32 to vector<1x128xi32>
    %19 = arith.cmpi eq, %7, %18 : vector<1x128xi32>
    %cst_8 = arith.constant 0.000000e+00 : f32
    %20 = vector.shape_cast %17 : vector<1x1xf32> to vector<1x1xf32>
    %21 = vector.broadcast %20 : vector<1x1xf32> to vector<1x128xf32>
    %22 = vector.broadcast %cst_8 : f32 to vector<1x128xf32>
    %23 = arith.select %19, %21, %22 : vector<1x128xi1>, vector<1x128xf32>
    %24 = arith.addf %8, %23 : vector<1x128xf32>
    %c2_i32 = arith.constant 2 : i32
    %25 = vector.broadcast %c2_i32 : i32 to vector<1x8xi32>
    %26 = arith.cmpi eq, %6, %25 : vector<1x8xi32>
    %c3_i32 = arith.constant 3 : i32
    %27 = vector.broadcast %c3_i32 : i32 to vector<1x8xi32>
    %28 = arith.cmpi eq, %6, %27 : vector<1x8xi32>
    %29 = arith.ori %26, %28 : vector<1x8xi1>
    %cst_9 = arith.constant 0.000000e+00 : f32
    %30 = vector.broadcast %cst_9 : f32 to vector<1x8xf32>
    %31 = arith.select %29, %5, %30 : vector<1x8xi1>, vector<1x8xf32>
    %cst_10 = arith.constant dense<0.000000e+00> : vector<1xf32>
    %32 = vector.multi_reduction <add>, %31, %cst_10 [1] : vector<1x8xf32> to vector<1xf32>
    %33 = vector.shape_cast %32 : vector<1xf32> to vector<1x1xf32>
    %c1_i32_11 = arith.constant 1 : i32
    %34 = vector.broadcast %c1_i32_11 : i32 to vector<1x128xi32>
    %35 = arith.cmpi eq, %7, %34 : vector<1x128xi32>
    %cst_12 = arith.constant 0.000000e+00 : f32
    %36 = vector.shape_cast %33 : vector<1x1xf32> to vector<1x1xf32>
    %37 = vector.broadcast %36 : vector<1x1xf32> to vector<1x128xf32>
    %38 = vector.broadcast %cst_12 : f32 to vector<1x128xf32>
    %39 = arith.select %35, %37, %38 : vector<1x128xi1>, vector<1x128xf32>
    %40 = arith.addf %24, %39 : vector<1x128xf32>
    %c4_i32 = arith.constant 4 : i32
    %41 = vector.broadcast %c4_i32 : i32 to vector<1x8xi32>
    %42 = arith.cmpi eq, %6, %41 : vector<1x8xi32>
    %c5_i32 = arith.constant 5 : i32
    %43 = vector.broadcast %c5_i32 : i32 to vector<1x8xi32>
    %44 = arith.cmpi eq, %6, %43 : vector<1x8xi32>
    %45 = arith.ori %42, %44 : vector<1x8xi1>
    %cst_13 = arith.constant 0.000000e+00 : f32
    %46 = vector.broadcast %cst_13 : f32 to vector<1x8xf32>
    %47 = arith.select %45, %5, %46 : vector<1x8xi1>, vector<1x8xf32>
    %cst_14 = arith.constant dense<0.000000e+00> : vector<1xf32>
    %48 = vector.multi_reduction <add>, %47, %cst_14 [1] : vector<1x8xf32> to vector<1xf32>
    %49 = vector.shape_cast %48 : vector<1xf32> to vector<1x1xf32>
    %c2_i32_15 = arith.constant 2 : i32
    %50 = vector.broadcast %c2_i32_15 : i32 to vector<1x128xi32>
    %51 = arith.cmpi eq, %7, %50 : vector<1x128xi32>
    %cst_16 = arith.constant 0.000000e+00 : f32
    %52 = vector.shape_cast %49 : vector<1x1xf32> to vector<1x1xf32>
    %53 = vector.broadcast %52 : vector<1x1xf32> to vector<1x128xf32>
    %54 = vector.broadcast %cst_16 : f32 to vector<1x128xf32>
    %55 = arith.select %51, %53, %54 : vector<1x128xi1>, vector<1x128xf32>
    %56 = arith.addf %40, %55 : vector<1x128xf32>
    %c6_i32 = arith.constant 6 : i32
    %57 = vector.broadcast %c6_i32 : i32 to vector<1x8xi32>
    %58 = arith.cmpi eq, %6, %57 : vector<1x8xi32>
    %c7_i32 = arith.constant 7 : i32
    %59 = vector.broadcast %c7_i32 : i32 to vector<1x8xi32>
    %60 = arith.cmpi eq, %6, %59 : vector<1x8xi32>
    %61 = arith.ori %58, %60 : vector<1x8xi1>
    %cst_17 = arith.constant 0.000000e+00 : f32
    %62 = vector.broadcast %cst_17 : f32 to vector<1x8xf32>
    %63 = arith.select %61, %5, %62 : vector<1x8xi1>, vector<1x8xf32>
    %cst_18 = arith.constant dense<0.000000e+00> : vector<1xf32>
    %64 = vector.multi_reduction <add>, %63, %cst_18 [1] : vector<1x8xf32> to vector<1xf32>
    %65 = vector.shape_cast %64 : vector<1xf32> to vector<1x1xf32>
    %c3_i32_19 = arith.constant 3 : i32
    %66 = vector.broadcast %c3_i32_19 : i32 to vector<1x128xi32>
    %67 = arith.cmpi eq, %7, %66 : vector<1x128xi32>
    %cst_20 = arith.constant 0.000000e+00 : f32
    %68 = vector.shape_cast %65 : vector<1x1xf32> to vector<1x1xf32>
    %69 = vector.broadcast %68 : vector<1x1xf32> to vector<1x128xf32>
    %70 = vector.broadcast %cst_20 : f32 to vector<1x128xf32>
    %71 = arith.select %67, %69, %70 : vector<1x128xi1>, vector<1x128xf32>
    %72 = arith.addf %56, %71 : vector<1x128xf32>
    %cst_21 = arith.constant 0.000000e+00 : f32
    %73 = vector.broadcast %cst_21 : f32 to vector<1x128xf32>
    %74 = vector.extract_strided_slice %1 {offsets = [1, 0], sizes = [1, 128], strides = [1, 1]} : vector<8x128xf32> to vector<1x128xf32>
    %75 = arith.mulf %74, %72 : vector<1x128xf32>
    %cst_22 = arith.constant dense<0.000000e+00> : vector<1xf32>
    %76 = vector.multi_reduction <add>, %75, %cst_22 [1] : vector<1x128xf32> to vector<1xf32>
    %77 = vector.shape_cast %76 : vector<1xf32> to vector<1x1xf32>
    %c0_i32_23 = arith.constant 0 : i32
    %78 = vector.broadcast %c0_i32_23 : i32 to vector<1x128xi32>
    %79 = arith.cmpi eq, %7, %78 : vector<1x128xi32>
    %80 = arith.negf %77 : vector<1x1xf32>
    %81 = math.exp %80 : vector<1x1xf32>
    %cst_24 = arith.constant 1.000000e+00 : f32
    %82 = vector.broadcast %cst_24 : f32 to vector<1x1xf32>
    %83 = arith.addf %82, %81 : vector<1x1xf32>
    %84 = arith.divf %82, %83 : vector<1x1xf32>
    %cst_25 = arith.constant 0.000000e+00 : f32
    %85 = vector.shape_cast %84 : vector<1x1xf32> to vector<1x1xf32>
    %86 = vector.broadcast %85 : vector<1x1xf32> to vector<1x128xf32>
    %87 = vector.broadcast %cst_25 : f32 to vector<1x128xf32>
    %88 = arith.select %79, %86, %87 : vector<1x128xi1>, vector<1x128xf32>
    %89 = arith.addf %73, %88 : vector<1x128xf32>
    %90 = vector.extract_strided_slice %1 {offsets = [2, 0], sizes = [1, 128], strides = [1, 1]} : vector<8x128xf32> to vector<1x128xf32>
    %91 = arith.mulf %90, %72 : vector<1x128xf32>
    %cst_26 = arith.constant dense<0.000000e+00> : vector<1xf32>
    %92 = vector.multi_reduction <add>, %91, %cst_26 [1] : vector<1x128xf32> to vector<1xf32>
    %93 = vector.shape_cast %92 : vector<1xf32> to vector<1x1xf32>
    %c1_i32_27 = arith.constant 1 : i32
    %94 = vector.broadcast %c1_i32_27 : i32 to vector<1x128xi32>
    %95 = arith.cmpi eq, %7, %94 : vector<1x128xi32>
    %96 = arith.negf %93 : vector<1x1xf32>
    %97 = math.exp %96 : vector<1x1xf32>
    %cst_28 = arith.constant 1.000000e+00 : f32
    %98 = vector.broadcast %cst_28 : f32 to vector<1x1xf32>
    %99 = arith.addf %98, %97 : vector<1x1xf32>
    %100 = arith.divf %98, %99 : vector<1x1xf32>
    %cst_29 = arith.constant 0.000000e+00 : f32
    %101 = vector.shape_cast %100 : vector<1x1xf32> to vector<1x1xf32>
    %102 = vector.broadcast %101 : vector<1x1xf32> to vector<1x128xf32>
    %103 = vector.broadcast %cst_29 : f32 to vector<1x128xf32>
    %104 = arith.select %95, %102, %103 : vector<1x128xi1>, vector<1x128xf32>
    %105 = arith.addf %89, %104 : vector<1x128xf32>
    %106 = vector.extract_strided_slice %1 {offsets = [3, 0], sizes = [1, 128], strides = [1, 1]} : vector<8x128xf32> to vector<1x128xf32>
    %107 = arith.mulf %106, %72 : vector<1x128xf32>
    %cst_30 = arith.constant dense<0.000000e+00> : vector<1xf32>
    %108 = vector.multi_reduction <add>, %107, %cst_30 [1] : vector<1x128xf32> to vector<1xf32>
    %109 = vector.shape_cast %108 : vector<1xf32> to vector<1x1xf32>
    %c2_i32_31 = arith.constant 2 : i32
    %110 = vector.broadcast %c2_i32_31 : i32 to vector<1x128xi32>
    %111 = arith.cmpi eq, %7, %110 : vector<1x128xi32>
    %112 = arith.negf %109 : vector<1x1xf32>
    %113 = math.exp %112 : vector<1x1xf32>
    %cst_32 = arith.constant 1.000000e+00 : f32
    %114 = vector.broadcast %cst_32 : f32 to vector<1x1xf32>
    %115 = arith.addf %114, %113 : vector<1x1xf32>
    %116 = arith.divf %114, %115 : vector<1x1xf32>
    %cst_33 = arith.constant 0.000000e+00 : f32
    %117 = vector.shape_cast %116 : vector<1x1xf32> to vector<1x1xf32>
    %118 = vector.broadcast %117 : vector<1x1xf32> to vector<1x128xf32>
    %119 = vector.broadcast %cst_33 : f32 to vector<1x128xf32>
    %120 = arith.select %111, %118, %119 : vector<1x128xi1>, vector<1x128xf32>
    %121 = arith.addf %105, %120 : vector<1x128xf32>
    %122 = vector.extract_strided_slice %1 {offsets = [4, 0], sizes = [1, 128], strides = [1, 1]} : vector<8x128xf32> to vector<1x128xf32>
    %123 = arith.mulf %122, %72 : vector<1x128xf32>
    %cst_34 = arith.constant dense<0.000000e+00> : vector<1xf32>
    %124 = vector.multi_reduction <add>, %123, %cst_34 [1] : vector<1x128xf32> to vector<1xf32>
    %125 = vector.shape_cast %124 : vector<1xf32> to vector<1x1xf32>
    %c3_i32_35 = arith.constant 3 : i32
    %126 = vector.broadcast %c3_i32_35 : i32 to vector<1x128xi32>
    %127 = arith.cmpi eq, %7, %126 : vector<1x128xi32>
    %128 = arith.negf %125 : vector<1x1xf32>
    %129 = math.exp %128 : vector<1x1xf32>
    %cst_36 = arith.constant 1.000000e+00 : f32
    %130 = vector.broadcast %cst_36 : f32 to vector<1x1xf32>
    %131 = arith.addf %130, %129 : vector<1x1xf32>
    %132 = arith.divf %130, %131 : vector<1x1xf32>
    %cst_37 = arith.constant 0.000000e+00 : f32
    %133 = vector.shape_cast %132 : vector<1x1xf32> to vector<1x1xf32>
    %134 = vector.broadcast %133 : vector<1x1xf32> to vector<1x128xf32>
    %135 = vector.broadcast %cst_37 : f32 to vector<1x128xf32>
    %136 = arith.select %127, %134, %135 : vector<1x128xi1>, vector<1x128xf32>
    %137 = arith.addf %121, %136 : vector<1x128xf32>
    %138 = arith.mulf %137, %72 : vector<1x128xf32>
    %cst_38 = arith.constant dense<0.000000e+00> : vector<1xf32>
    %139 = vector.multi_reduction <add>, %138, %cst_38 [1] : vector<1x128xf32> to vector<1xf32>
    %140 = vector.shape_cast %139 : vector<1xf32> to vector<1x1xf32>
    %c4_i32_39 = arith.constant 4 : i32
    %141 = vector.broadcast %c4_i32_39 : i32 to vector<1x128xi32>
    %142 = arith.cmpi eq, %7, %141 : vector<1x128xi32>
    %cst_40 = arith.constant 0.000000e+00 : f32
    %143 = vector.shape_cast %140 : vector<1x1xf32> to vector<1x1xf32>
    %144 = vector.broadcast %143 : vector<1x1xf32> to vector<1x128xf32>
    %145 = vector.broadcast %cst_40 : f32 to vector<1x128xf32>
    %146 = arith.select %142, %144, %145 : vector<1x128xi1>, vector<1x128xf32>
    %147 = arith.addf %72, %146 : vector<1x128xf32>
    %c0_41 = arith.constant 0 : index
    %c0_42 = arith.constant 0 : index
    %148 = vector.load %arg2[%c0_41, %c0_42] : memref<1x128xf32, #tpu.memory_space<vmem>>, vector<1x128xf32>
    tpu.vector_store %arg2[%c0_41, %c0_42], %147 {strides = array<i32>} : memref<1x128xf32, #tpu.memory_space<vmem>>, vector<1x128xf32>,
    return
  }
}

</mosaic_0001>

<bundles_post_ra>
// kernel: _forward_single.1
= control target key start
LH: loop header
LB: loop body
LE: loop exit
PB: predicated region body
PF: predicated region fallthrough
CT: control target
= control target key end

     0   :  { %vm105_vm10 = vcmask 57344   ;;  %vm157_vm13 = vcmask 1042434   ;;  %vm142_vm14 = vcmask 1041409   ;;  %vm175_vm15 = vcmask 1043459   ;;  %s431_s1 = inlined_call_operand.vmem [shape: f32[8,2688], index: 1, kind: input, shape index: {}]   ;;  %s432_s0 = inlined_call_operand.vmem [shape: f32[1,8,2560], index: 0, kind: input, shape index: {}]   ;;  %s433_s2 = inlined_call_operand.vmem [shape: f32[1,128], index: 2, kind: output, shape index: {}]  }
   0x1   :  { %v11_v0 = vld [vmem:[%s431_s1] sm:$0xff]  ;;  %v12_v1 = vld [vmem:[%s431_s1 + $0x8] sm:$0xff]  ;;  %v13_v2 = vld [vmem:[%s431_s1 + $0x10] sm:$0xff] }
   0x2   :  { %v14_v3 = vld [vmem:[%s431_s1 + $0x18] sm:$0xff]  ;;  %v32_v4 = vld [vmem:[%s432_s0] sm:$0xff]  ;;  %v33_v5 = vld [vmem:[%s432_s0 + $0x8] sm:$0xff] }
   0x3   :  { %v34_v6 = vld [vmem:[%s432_s0 + $0x10] sm:$0xff]  ;;  %v35_v7 = vld [vmem:[%s432_s0 + $0x18] sm:$0xff]  ;;  %v52_v8 = vmul.f32 %v32_v4, %v11_v0  ;;  %v53_v9 = vmul.f32 %v33_v5, %v12_v1  ;;  %v15_v11 = vld [vmem:[%s431_s1 + $0x20] sm:$0xff] }
   0x4   :  { %v54_v10 = vmul.f32 %v34_v6, %v13_v2  ;;  %v36_v12 = vld [vmem:[%s432_s0 + $0x20] sm:$0xff]  ;;  %v55_v13 = vmul.f32 %v35_v7, %v14_v3  ;;  %v16_v15 = vld [vmem:[%s431_s1 + $0x28] sm:$0xff]  ;;  %v17_v19 = vld [vmem:[%s431_s1 + $0x30] sm:$0xff] }
   0x5   :  { %v72_v14 = vadd.f32 %v53_v9, %v52_v8  ;;  %v37_v16 = vld [vmem:[%s432_s0 + $0x28] sm:$0xff]  ;;  %v56_v17 = vmul.f32 %v36_v12, %v15_v11  ;;  %v38_v20 = vld [vmem:[%s432_s0 + $0x30] sm:$0xff]  ;;  %v18_v23 = vld [vmem:[%s431_s1 + $0x38] sm:$0xff] }
   0x6   :  { %v57_v21 = vmul.f32 %v37_v16, %v16_v15  ;;  %v39_v24 = vld [vmem:[%s432_s0 + $0x38] sm:$0xff]  ;;  %v58_v25 = vmul.f32 %v38_v20, %v17_v19  ;;  %v19_v27 = vld [vmem:[%s431_s1 + $0x40] sm:$0xff]  ;;  %v20_v31 = vld [vmem:[%s431_s1 + $0x48] sm:$0xff]  ;;  %v93_v15 = vlaneseq }
   0x7   :  { %v73_v18 = vadd.f32 %v72_v14, %v54_v10  ;;  %v40_v28 = vld [vmem:[%s432_s0 + $0x40] sm:$0xff]  ;;  %v59_v29 = vmul.f32 %v39_v24, %v18_v23  ;;  %v41_v32 = vld [vmem:[%s432_s0 + $0x48] sm:$0xff]  ;;  %v21_v35 = vld [vmem:[%s431_s1 + $0x50] sm:$0xff] }
   0x8   :  { %v60_v33 = vmul.f32 %v40_v28, %v19_v27  ;;  %v42_v36 = vld [vmem:[%s432_s0 + $0x50] sm:$0xff]  ;;  %v61_v37 = vmul.f32 %v41_v32, %v20_v31  ;;  %v22_v39 = vld [vmem:[%s431_s1 + $0x58] sm:$0xff]  ;;  %v23_v43 = vld [vmem:[%s431_s1 + $0x60] sm:$0xff]  ;;  %v377_v16 = vand.u32 127, %v93_v15 }
   0x9   :  { %v74_v22 = vadd.f32 %v73_v18, %v55_v13  ;;  %v43_v40 = vld [vmem:[%s432_s0 + $0x58] sm:$0xff]  ;;  %v62_v41 = vmul.f32 %v42_v36, %v21_v35  ;;  %v44_v44 = vld [vmem:[%s432_s0 + $0x60] sm:$0xff]  ;;  %v24_v47 = vld [vmem:[%s431_s1 + $0x68] sm:$0xff] }
   0xa   :  { %v63_v45 = vmul.f32 %v43_v40, %v22_v39  ;;  %v45_v48 = vld [vmem:[%s432_s0 + $0x68] sm:$0xff]  ;;  %v64_v49 = vmul.f32 %v44_v44, %v23_v43  ;;  %v25_v51 = vld [vmem:[%s431_s1 + $0x70] sm:$0xff]  ;;  %v26_v55 = vld [vmem:[%s431_s1 + $0x78] sm:$0xff]  ;;  %vm111_vm0 = vcmp.eq.s32.totalorder %v377_v16, 2  ;;  %vm112_vm1 = vcmp.eq.s32.totalorder %v377_v16, 3 }
   0xb   :  { %v75_v26 = vadd.f32 %v74_v22, %v56_v17  ;;  %v46_v52 = vld [vmem:[%s432_s0 + $0x70] sm:$0xff]  ;;  %v65_v53 = vmul.f32 %v45_v48, %v24_v47  ;;  %v47_v56 = vld [vmem:[%s432_s0 + $0x78] sm:$0xff]  ;;  %v27_v59 = vld [vmem:[%s431_s1 + $0x80] sm:$0xff]  ;;  %v100_v17 = vshrl.u32 %v93_v15, 7  ;;  %vm95_vm2 = vcmp.eq.s32.totalorder %v377_v16, 0 }
   0xc   :  { %v66_v57 = vmul.f32 %v46_v52, %v25_v51  ;;  %v48_v60 = vld [vmem:[%s432_s0 + $0x80] sm:$0xff]  ;;  %v67_v61 = vmul.f32 %v47_v56, %v26_v55  ;;  %v28_v63 = vld [vmem:[%s431_s1 + $0x88] sm:$0xff]  ;;  %v29_v3 = vld [vmem:[%s431_s1 + $0x90] sm:$0xff]  ;;  %vm96_vm3 = vcmp.eq.s32.totalorder %v377_v16, 1  ;;  %vm120_vm4 = vcmp.eq.s32.totalorder %v377_v16, 4 }
   0xd   :  { %v76_v30 = vadd.f32 %v75_v26, %v57_v21  ;;  %v49_v0 = vld [vmem:[%s432_s0 + $0x88] sm:$0xff]  ;;  %v68_v1 = vmul.f32 %v48_v60, %v27_v59  ;;  %v50_v4 = vld [vmem:[%s432_s0 + $0x90] sm:$0xff]  ;;  %v30_v7 = vld [vmem:[%s431_s1 + $0x98] sm:$0xff]  ;;  %v101_v18 = vsub.s32 %v377_v16, %v100_v17  ;;  %vm121_vm5 = vcmp.eq.s32.totalorder %v377_v16, 5 }
   0xe   :  { %v69_v5 = vmul.f32 %v49_v0, %v28_v63  ;;  %v51_v8 = vld [vmem:[%s432_s0 + $0x98] sm:$0xff]  ;;  %v70_v9 = vmul.f32 %v50_v4, %v29_v3  ;;  %vm113_vm6 = vmor %vm111_vm0, %vm112_vm1  ;;  %vm129_vm7 = vcmp.eq.s32.totalorder %v377_v16, 6  ;;  %vm130_vm8 = vcmp.eq.s32.totalorder %v377_v16, 7 }
   0xf   :  { %v77_v34 = vadd.f32 %v76_v30, %v58_v25  ;;  %v71_v11 = vmul.f32 %v51_v8, %v30_v7  ;;  %vm97_vm9 = vmor %vm95_vm2, %vm96_vm3 }
  0x10   :  { %vm122_vm11 = vmor %vm120_vm4, %vm121_vm5  ;;  %vm193_vm5 = vcmask 1044484  }
  0x11   :  { %v78_v38 = vadd.f32 %v77_v34, %v59_v29  ;;  %vm131_vm12 = vmor %vm129_vm7, %vm130_vm8  ;;  %v31_v29 = vld [vmem:[%s431_s1 + $0xa0] sm:$0xff] }
  0x13   :  { %v79_v42 = vadd.f32 %v78_v38, %v60_v33 }
  0x15   :  { %v80_v46 = vadd.f32 %v79_v42, %v61_v37 }
  0x17   :  { %v81_v50 = vadd.f32 %v80_v46, %v62_v41 }
  0x19   :  { %v82_v54 = vadd.f32 %v81_v50, %v63_v45 }
  0x1b   :  { %v83_v58 = vadd.f32 %v82_v54, %v64_v49 }
  0x1d   :  { %v84_v62 = vadd.f32 %v83_v58, %v65_v53 }
  0x1f   :  { %v85_v2 = vadd.f32 %v84_v62, %v66_v57 }
  0x21   :  { %v86_v6 = vadd.f32 %v85_v2, %v67_v61 }
  0x23   :  { %v87_v10 = vadd.f32 %v86_v6, %v68_v1 }
  0x25   :  { %v88_v12 = vadd.f32 %v87_v10, %v69_v5 }
  0x27   :  { %v89_v13 = vadd.f32 %v88_v12, %v70_v9 }
  0x29   :  { %v90_v14 = vadd.f32 %v89_v13, %v71_v11 }
  0x2b   :  { %91 = vadd.xlane.f32.xlu0 %v90_v14 }
  0xb4   :  { %v92_v19 = vpop.xlane.xlu0 %91 }
  0xb5   :  { %v102_v20 = vrot.slane %v92_v19, %v101_v18 }
  0xb7   :  { %v114_v21 = vsel %vm113_vm6, %v102_v20, 0.0  ;;  %v104_v22 = vsel %vm97_vm9, %v102_v20, 0.0  ;;  %v123_v25 = vsel %vm122_vm11, %v102_v20, 0.0  ;;  %v132_v26 = vsel %vm131_vm12, %v102_v20, 0.0 }
  0xb8   :  { %v115_v23 = vsel %vm105_vm10, %v114_v21, 0.0  ;;  %v106_v24 = vsel %vm105_vm10, %v104_v22, 0.0  ;;  %v124_v27 = vsel %vm105_vm10, %v123_v25, 0.0  ;;  %v133_v28 = vsel %vm105_vm10, %v132_v26, 0.0 }
  0xb9   :  { %116 = vadd.xlane.f32.xlu1 %v115_v23  ;;  %107 = vadd.xlane.f32.xlu0 %v106_v24 }
  0xbd   :  { %125 = vadd.xlane.f32.xlu1 %v124_v27  ;;  %134 = vadd.xlane.f32.xlu0 %v133_v28 }
 0x142   :  { %v117_v30 = vpop.xlane.xlu1 %116  ;;  %v108_v31 = vpop.xlane.xlu0 %107 }
 0x143   :  { %v109_v32 = vsel %vm95_vm2, %v108_v31, 0.0  ;;  %v118_v34 = vsel %vm96_vm3, %v117_v30, 0.0 }
 0x144   :  { %v110_v33 = vadd.f32 %v109_v32, %v31_v29 }
 0x146   :  { %v126_v35 = vpop.xlane.xlu1 %125  ;;  %v119_v36 = vadd.f32 %v118_v34, %v110_v33  ;;  %v135_v37 = vpop.xlane.xlu0 %134 }
 0x147   :  { %v127_v38 = vsel %vm111_vm0, %v126_v35, 0.0  ;;  %v136_v40 = vsel %vm112_vm1, %v135_v37, 0.0 }
 0x148   :  { %v128_v39 = vadd.f32 %v127_v38, %v119_v36 }
 0x14a   :  { %v409_v41 = vadd.f32 %v136_v40, %v128_v39 }
 0x14c   :  { %v154_v42 = vrot.slane %v409_v41, 6  ;;  %v139_v43 = vrot.slane %v409_v41, 7  ;;  %v172_v44 = vrot.slane %v409_v41, 5  ;;  %v190_v45 = vrot.slane %v409_v41, 4 }
 0x14e   :  { %v156_v46 = vmul.f32 %v154_v42, %v31_v29  ;;  %v141_v47 = vmul.f32 %v139_v43, %v31_v29  ;;  %v174_v50 = vmul.f32 %v172_v44, %v31_v29  ;;  %v192_v51 = vmul.f32 %v190_v45, %v31_v29 }
 0x150   :  { %v158_v48 = vsel %vm157_vm13, %v156_v46, 0.0  ;;  %v143_v49 = vsel %vm142_vm14, %v141_v47, 0.0  ;;  %v176_v52 = vsel %vm175_vm15, %v174_v50, 0.0  ;;  %v194_v53 = vsel %vm193_vm5, %v192_v51, 0.0 }
 0x151   :  { %159 = vadd.xlane.f32.xlu1 %v158_v48  ;;  %144 = vadd.xlane.f32.xlu0 %v143_v49 }
 0x155   :  { %177 = vadd.xlane.f32.xlu1 %v176_v52  ;;  %195 = vadd.xlane.f32.xlu0 %v194_v53 }
 0x1da   :  { %v160_v54 = vpop.xlane.xlu1 %159  ;;  %v145_v55 = vpop.xlane.xlu0 %144 }
 0x1db   :  { %v223_v56 = vmul.f32 -1.442695, %v160_v54  ;;  %v222_v57 = vmul.f32 -1.442695, %v145_v55 }
 0x1dd   :  { %226 = vpow2.f32 %v223_v56 }
 0x1de   :  { %228 = vpow2.f32 %v222_v57  ;;  %v178_v58 = vpop.xlane.xlu1 %177  ;;  %v196_v59 = vpop.xlane.xlu0 %195 }
 0x1df   :  { %v224_v60 = vmul.f32 -1.442695, %v178_v58  ;;  %v225_v61 = vmul.f32 -1.442695, %v196_v59 }
 0x1e1   :  { %230 = vpow2.f32 %v224_v60 }
 0x1e2   :  { %232 = vpow2.f32 %v225_v61 }
 0x1ea   :  { %v227_v62 = vpop.eup %226 }
 0x1eb   :  { %v229_v63 = vpop.eup %228  ;;  %v164_v0 = vadd.f32 1.0, %v227_v62 }
 0x1ec   :  { %v149_v1 = vadd.f32 1.0, %v229_v63 }
 0x1ed   :  { %234 = vrcp.f32 %v164_v0 }
 0x1ee   :  { %v231_v2 = vpop.eup %230  ;;  %236 = vrcp.f32 %v149_v1 }
 0x1ef   :  { %v233_v3 = vpop.eup %232  ;;  %v182_v4 = vadd.f32 1.0, %v231_v2 }
 0x1f0   :  { %v200_v5 = vadd.f32 1.0, %v233_v3 }
 0x1f1   :  { %238 = vrcp.f32 %v182_v4 }
 0x1f2   :  { %240 = vrcp.f32 %v200_v5 }
 0x1fa   :  { %v235_v6 = vpop.eup %234 }
 0x1fb   :  { %v167_v7 = vsel %vm96_vm3, %v235_v6, 0.0  ;;  %v237_v8 = vpop.eup %236 }
 0x1fc   :  { %v169_v9 = vrot.slane %v167_v7, 1  ;;  %v152_v12 = vsel %vm95_vm2, %v237_v8, 0.0 }
 0x1fe   :  { %v239_v10 = vpop.eup %238  ;;  %v171_v14 = vadd.f32 %v169_v9, %v152_v12 }
 0x1ff   :  { %v241_v11 = vpop.eup %240  ;;  %v185_v13 = vsel %vm111_vm0, %v239_v10, 0.0 }
 0x200   :  { %v187_v15 = vrot.slane %v185_v13, 2  ;;  %v203_v17 = vsel %vm112_vm1, %v241_v11, 0.0 }
 0x201   :  { %v205_v19 = vrot.slane %v203_v17, 3 }
 0x202   :  { %v189_v18 = vadd.f32 %v187_v15, %v171_v14 }
 0x204   :  { %v207_v20 = vadd.f32 %v205_v19, %v189_v18 }
 0x206   :  { %v208_v21 = vmul.f32 %v207_v20, %v139_v43 }
 0x208   :  { %v209_v22 = vsel %vm142_vm14, %v208_v21, 0.0 }
 0x209   :  { %210 = vadd.xlane.f32.xlu1 %v209_v22 }
 0x292   :  { %v211_v23 = vpop.xlane.xlu1 %210 }
 0x293   :  { %v212_v24 = vsel %vm120_vm4, %v211_v23, 0.0 }
 0x294   :  { %v214_v25 = vrot.slane %v212_v24, 1 }
 0x296   :  { %v216_v26 = vadd.f32 %v214_v25, %v409_v41 }
 0x298   :  { %217 = vst [vmem:[%s433_s2] sm:$0x1] %v216_v26 }

</bundles_post_ra>
